<compile_context>
chip_gen: v6e
topology: v6e:2x2x1
jax: 0.10.0
libtpu: 0.0.40
codegen_flags: <defaults>
</compile_context>

<pallas_src>
import functools

import jax
import jax.numpy as jnp
from jax.experimental import pallas as pl
from jax.experimental.pallas import tpu as pltpu

_NEG_SLOPE = 0.2
_MASK_VALUE = -1e30


def _gat_layer(h, adj, w_ref, al_ref, ar_ref, b_ref):
    """One dense GATConv (num_heads=1). h: [N, F] f32, adj: [N, N] f32 mask."""
    # Linear projection on the MXU: bf16 inputs, f32 accumulation.
    z = jnp.dot(h.astype(jnp.bfloat16), w_ref[...],
                preferred_element_type=jnp.float32)               # [N, H] f32

    # Attention score terms (f32). Loaded once per layer -> naturally hoisted.
    al = al_ref[...]                                              # [1, H]
    ar = ar_ref[...]                                              # [1, H]
    er = jnp.sum(z * ar, axis=-1, keepdims=True)                  # [N, 1] per-dst
    # el as a row vector: al @ z^T via dot_general (contract both last dims),
    # avoiding an explicit transpose of z.
    el_row = jax.lax.dot_general(                                 # [1, N] per-src
        al, z, (((1,), (1,)), ((), ())),
        preferred_element_type=jnp.float32)

    # e[dst, src] = leaky_relu(el[src] + er[dst]); mask non-edges.
    e = er + el_row                                               # [N, N]
    e = jnp.where(e > 0, e, _NEG_SLOPE * e)
    e = jnp.where(adj > 0, e, _MASK_VALUE)

    # Softmax over incoming edges (src axis) for each destination node.
    m = jnp.max(e, axis=-1, keepdims=True)
    p = jnp.exp(e - m)
    s = jnp.sum(p, axis=-1, keepdims=True)
    alpha = p * pl.reciprocal(s, approx=True)                     # [N, N]

    # Aggregate neighbor features on the MXU, add bias in f32.
    out = jnp.dot(alpha.astype(jnp.bfloat16), z.astype(jnp.bfloat16),
                  preferred_element_type=jnp.float32)             # [N, H]
    return out + b_ref[...]


def gat2_kernel(x_ref, adj_ref, w1_ref, al1_ref, ar1_ref, b1_ref,
                w2_ref, al2_ref, ar2_ref, b2_ref, o_ref):
    adj = adj_ref[...]
    h = _gat_layer(x_ref[...], adj, w1_ref, al1_ref, ar1_ref, b1_ref)
    h = jnp.maximum(h, 0.0)                                       # F.relu
    h = _gat_layer(h, adj, w2_ref, al2_ref, ar2_ref, b2_ref)
    o_ref[...] = h.astype(o_ref.dtype)


def _round_up(x, m):
    return (x + m - 1) // m * m


def _pad2(a, rows, cols):
    r, c = a.shape
    return jnp.pad(a, ((0, rows - r), (0, cols - c)))


def gat2_forward(x, adj, params):
    """Two-layer GAT forward.

    x: [N, in_feats] f32; adj: [N, N] {0,1} with adj[dst, src] = 1 per edge
    src->dst (self-loops included). params = (w1, al1, ar1, b1, w2, al2, ar2,
    b2); w*: [in, out] (transposed vs. torch fc weight), al*/ar*/b*: [1, out].
    """
    w1, al1, ar1, b1, w2, al2, ar2, b2 = params
    n, fin = x.shape
    hf = w1.shape[1]

    # Pad rows to the 8-sublane granule, feature dims to full 128 lanes.
    n_p = _round_up(n, 8)
    fin_p = _round_up(fin, 128)
    h_p = _round_up(hf, 128)

    x_p = _pad2(x.astype(jnp.float32), n_p, fin_p)
    adj_p = _pad2(adj.astype(jnp.float32), n_p, n_p)    # padded nodes isolated
    w1_p = _pad2(w1.astype(jnp.float32), fin_p, h_p).astype(jnp.bfloat16)
    w2_p = _pad2(w2.astype(jnp.float32), h_p, h_p).astype(jnp.bfloat16)
    al1_p, ar1_p, b1_p = (_pad2(a.astype(jnp.float32), 1, h_p)
                          for a in (al1, ar1, b1))
    al2_p, ar2_p, b2_p = (_pad2(a.astype(jnp.float32), 1, h_p)
                          for a in (al2, ar2, b2))

    inputs = (x_p, adj_p, w1_p, al1_p, ar1_p, b1_p, w2_p, al2_p, ar2_p, b2_p)
    full = lambda shape: pl.BlockSpec(shape, lambda: (0,) * len(shape))

    flops = (2 * n_p * h_p * (fin_p + h_p)          # the two fc matmuls
             + 2 * 2 * n_p * n_p * h_p              # the two alpha @ z matmuls
             + 2 * (4 * n_p * h_p + 6 * n_p * n_p)) # scores + softmax misc
    transcendentals = 2 * n_p * n_p + 2 * n_p
    bytes_accessed = (sum(int(a.size) * a.dtype.itemsize for a in inputs)
                      + n_p * h_p * 4)

    out = pl.pallas_call(
        gat2_kernel,
        out_shape=jax.ShapeDtypeStruct((n_p, h_p), jnp.float32),
        grid=(),
        in_specs=[full(a.shape) for a in inputs],
        out_specs=full((n_p, h_p)),
        cost_estimate=pl.CostEstimate(
            flops=flops, transcendentals=transcendentals,
            bytes_accessed=bytes_accessed),
        compiler_params=pltpu.CompilerParams(
            vmem_limit_bytes=32 * 1024 * 1024),
    )(*inputs)

    # Un-pad. num_heads=1 is implicit in the dense layout -> already squeezed.
    return out[:n, :hf]


def init_gatconv(key, in_feats, out_feats, dtype=jnp.float32):
    """DGL-GATConv-style parameters (num_heads=1): xavier_normal(gain=sqrt(2))
    fc/attention weights; small nonzero bias to exercise the bias path."""
    kw, kl, kr, kb = jax.random.split(key, 4)
    gain = 2.0 ** 0.5
    w = gain * (2.0 / (in_feats + out_feats)) ** 0.5 * \
        jax.random.normal(kw, (in_feats, out_feats), dtype)
    al = gain * (2.0 / (1 + out_feats)) ** 0.5 * \
        jax.random.normal(kl, (1, out_feats), dtype)
    ar = gain * (2.0 / (1 + out_feats)) ** 0.5 * \
        jax.random.normal(kr, (1, out_feats), dtype)
    b = 0.1 * jax.random.normal(kb, (1, out_feats), dtype)
    return w, al, ar, b


def _gat_layer_ref(h, adj, w, al, ar, b):
    """Pure-JAX dense GATConv reference mirroring the kernel's dtype casts."""
    z = jnp.dot(h.astype(jnp.bfloat16), w.astype(jnp.bfloat16),
                preferred_element_type=jnp.float32)
    el = jnp.sum(z * al, axis=-1)
    er = jnp.sum(z * ar, axis=-1)
    e = er[:, None] + el[None, :]
    e = jnp.where(e > 0, e, _NEG_SLOPE * e)
    e = jnp.where(adj > 0, e, _MASK_VALUE)
    alpha = jax.nn.softmax(e, axis=-1)
    out = jnp.dot(alpha.astype(jnp.bfloat16), z.astype(jnp.bfloat16),
                  preferred_element_type=jnp.float32)
    return out + b


def gat2_ref(x, adj, params):
    w1, al1, ar1, b1, w2, al2, ar2, b2 = params
    h = _gat_layer_ref(x, adj, w1, al1, ar1, b1)
    h = jnp.maximum(h, 0.0)
    return _gat_layer_ref(h, adj, w2, al2, ar2, b2)


if __name__ == "__main__":
    key = jax.random.PRNGKey(0)
    k_adj, k_x, k_p1, k_p2 = jax.random.split(key, 4)

    N, IN_FEATS, H_FEATS = 16, 16, 32

    # Small deterministic undirected graph with self-loops; adj[dst, src].
    adj = (jax.random.uniform(k_adj, (N, N)) < 0.3).astype(jnp.float32)
    adj = jnp.maximum(adj, adj.T)
    adj = jnp.maximum(adj, jnp.eye(N, dtype=jnp.float32))

    x = jax.random.normal(k_x, (N, IN_FEATS), jnp.float32)
    params = (init_gatconv(k_p1, IN_FEATS, H_FEATS)
              + init_gatconv(k_p2, H_FEATS, H_FEATS))

    fwd = jax.jit(functools.partial(gat2_forward, params=params))
    out = fwd(x, adj)
    out = jax.block_until_ready(out)

    ref = gat2_ref(x, adj, params)
    assert out.shape == (N, H_FEATS)
    assert jnp.allclose(out, ref, atol=2e-2, rtol=2e-2), \
        float(jnp.max(jnp.abs(out - ref)))

    print("KERNEL_OK")
</pallas_src>

<mosaic_0001>
module attributes {stable_mosaic.version = 11 : i64} {
  func.func @gat2_kernel(%arg0: memref<16x128xf32, #tpu.memory_space<vmem>>, %arg1: memref<16x16xf32, #tpu.memory_space<vmem>>, %arg2: memref<128x128xbf16, #tpu.memory_space<vmem>>, %arg3: memref<1x128xf32, #tpu.memory_space<vmem>>, %arg4: memref<1x128xf32, #tpu.memory_space<vmem>>, %arg5: memref<1x128xf32, #tpu.memory_space<vmem>>, %arg6: memref<128x128xbf16, #tpu.memory_space<vmem>>, %arg7: memref<1x128xf32, #tpu.memory_space<vmem>>, %arg8: memref<1x128xf32, #tpu.memory_space<vmem>>, %arg9: memref<1x128xf32, #tpu.memory_space<vmem>>, %arg10: memref<16x128xf32, #tpu.memory_space<vmem>>) attributes {dimension_semantics = [], scalar_prefetch = 0 : i64, scratch_operands = 0 : i64, tpu.core_type = #tpu.core_type<tc>} {
    %c0 = arith.constant 0 : index
    %c0_0 = arith.constant 0 : index
    %0 = vector.load %arg1[%c0, %c0_0] : memref<16x16xf32, #tpu.memory_space<vmem>>, vector<16x16xf32>
    %c0_1 = arith.constant 0 : index
    %c0_2 = arith.constant 0 : index
    %1 = vector.load %arg0[%c0_1, %c0_2] : memref<16x128xf32, #tpu.memory_space<vmem>>, vector<16x128xf32>
    %2 = arith.truncf %1 : vector<16x128xf32> to vector<16x128xbf16>
    %c0_3 = arith.constant 0 : index
    %c0_4 = arith.constant 0 : index
    %3 = vector.load %arg2[%c0_3, %c0_4] : memref<128x128xbf16, #tpu.memory_space<vmem>>, vector<128x128xbf16>
    %cst = arith.constant dense<0.000000e+00> : vector<16x128xf32>
    %4 = tpu.matmul %2, %3, %cst {dimension_numbers = #tpu.dot_dimension_numbers<[1], [0], [0], [1], [0, 0, 1, 1], [], []>} : vector<16x128xbf16>, vector<128x128xbf16>, vector<16x128xf32> -> vector<16x128xf32>
    %c0_5 = arith.constant 0 : index
    %c0_6 = arith.constant 0 : index
    %5 = vector.load %arg3[%c0_5, %c0_6] : memref<1x128xf32, #tpu.memory_space<vmem>>, vector<1x128xf32>
    %c0_7 = arith.constant 0 : index
    %c0_8 = arith.constant 0 : index
    %6 = vector.load %arg4[%c0_7, %c0_8] : memref<1x128xf32, #tpu.memory_space<vmem>>, vector<1x128xf32>
    %7 = vector.broadcast %6 : vector<1x128xf32> to vector<16x128xf32>
    %8 = arith.mulf %4, %7 : vector<16x128xf32>
    %cst_9 = arith.constant dense<0.000000e+00> : vector<16xf32>
    %9 = vector.multi_reduction <add>, %8, %cst_9 [1] : vector<16x128xf32> to vector<16xf32>
    %10 = vector.shape_cast %9 : vector<16xf32> to vector<16x1xf32>
    %cst_10 = arith.constant dense<0.000000e+00> : vector<1x16xf32>
    %11 = tpu.matmul %5, %4, %cst_10 {dimension_numbers = #tpu.dot_dimension_numbers<[1], [1], [0], [0], [0, 0, 1, 0], [], []>} : vector<1x128xf32>, vector<16x128xf32>, vector<1x16xf32> -> vector<1x16xf32>
    %12 = vector.broadcast %10 : vector<16x1xf32> to vector<16x16xf32>
    %13 = vector.broadcast %11 : vector<1x16xf32> to vector<16x16xf32>
    %14 = arith.addf %12, %13 : vector<16x16xf32>
    %cst_11 = arith.constant 0.000000e+00 : f32
    %15 = vector.broadcast %cst_11 : f32 to vector<16x16xf32>
    %16 = arith.cmpf ogt, %14, %15 : vector<16x16xf32>
    %cst_12 = arith.constant 2.000000e-01 : f32
    %17 = vector.broadcast %cst_12 : f32 to vector<16x16xf32>
    %18 = arith.mulf %17, %14 : vector<16x16xf32>
    %19 = arith.select %16, %14, %18 : vector<16x16xi1>, vector<16x16xf32>
    %cst_13 = arith.constant 0.000000e+00 : f32
    %20 = vector.broadcast %cst_13 : f32 to vector<16x16xf32>
    %21 = arith.cmpf ogt, %0, %20 : vector<16x16xf32>
    %cst_14 = arith.constant -1.000000e+30 : f32
    %22 = vector.broadcast %cst_14 : f32 to vector<16x16xf32>
    %23 = arith.select %21, %19, %22 : vector<16x16xi1>, vector<16x16xf32>
    %cst_15 = arith.constant dense<0xFF800000> : vector<16xf32>
    %24 = vector.multi_reduction <maximumf>, %23, %cst_15 [1] : vector<16x16xf32> to vector<16xf32>
    %25 = vector.shape_cast %24 : vector<16xf32> to vector<16x1xf32>
    %26 = vector.broadcast %25 : vector<16x1xf32> to vector<16x16xf32>
    %27 = arith.subf %23, %26 : vector<16x16xf32>
    %28 = math.exp %27 : vector<16x16xf32>
    %cst_16 = arith.constant dense<0.000000e+00> : vector<16xf32>
    %29 = vector.multi_reduction <add>, %28, %cst_16 [1] : vector<16x16xf32> to vector<16xf32>
    %30 = vector.shape_cast %29 : vector<16xf32> to vector<16x1xf32>
    %31 = tpu.reciprocal %30 {approx = true} : vector<16x1xf32> -> vector<16x1xf32>
    %32 = vector.broadcast %31 : vector<16x1xf32> to vector<16x16xf32>
    %33 = arith.mulf %28, %32 : vector<16x16xf32>
    %34 = arith.truncf %33 : vector<16x16xf32> to vector<16x16xbf16>
    %35 = arith.truncf %4 : vector<16x128xf32> to vector<16x128xbf16>
    %cst_17 = arith.constant dense<0.000000e+00> : vector<16x128xf32>
    %36 = tpu.matmul %34, %35, %cst_17 {dimension_numbers = #tpu.dot_dimension_numbers<[1], [0], [0], [1], [0, 0, 1, 1], [], []>} : vector<16x16xbf16>, vector<16x128xbf16>, vector<16x128xf32> -> vector<16x128xf32>
    %c0_18 = arith.constant 0 : index
    %c0_19 = arith.constant 0 : index
    %37 = vector.load %arg5[%c0_18, %c0_19] : memref<1x128xf32, #tpu.memory_space<vmem>>, vector<1x128xf32>
    %38 = vector.broadcast %37 : vector<1x128xf32> to vector<16x128xf32>
    %39 = arith.addf %36, %38 : vector<16x128xf32>
    %cst_20 = arith.constant 0.000000e+00 : f32
    %40 = vector.broadcast %cst_20 : f32 to vector<16x128xf32>
    %41 = arith.maximumf %39, %40 : vector<16x128xf32>
    %42 = arith.truncf %41 : vector<16x128xf32> to vector<16x128xbf16>
    %c0_21 = arith.constant 0 : index
    %c0_22 = arith.constant 0 : index
    %43 = vector.load %arg6[%c0_21, %c0_22] : memref<128x128xbf16, #tpu.memory_space<vmem>>, vector<128x128xbf16>
    %cst_23 = arith.constant dense<0.000000e+00> : vector<16x128xf32>
    %44 = tpu.matmul %42, %43, %cst_23 {dimension_numbers = #tpu.dot_dimension_numbers<[1], [0], [0], [1], [0, 0, 1, 1], [], []>} : vector<16x128xbf16>, vector<128x128xbf16>, vector<16x128xf32> -> vector<16x128xf32>
    %c0_24 = arith.constant 0 : index
    %c0_25 = arith.constant 0 : index
    %45 = vector.load %arg7[%c0_24, %c0_25] : memref<1x128xf32, #tpu.memory_space<vmem>>, vector<1x128xf32>
    %c0_26 = arith.constant 0 : index
    %c0_27 = arith.constant 0 : index
    %46 = vector.load %arg8[%c0_26, %c0_27] : memref<1x128xf32, #tpu.memory_space<vmem>>, vector<1x128xf32>
    %47 = vector.broadcast %46 : vector<1x128xf32> to vector<16x128xf32>
    %48 = arith.mulf %44, %47 : vector<16x128xf32>
    %cst_28 = arith.constant dense<0.000000e+00> : vector<16xf32>
    %49 = vector.multi_reduction <add>, %48, %cst_28 [1] : vector<16x128xf32> to vector<16xf32>
    %50 = vector.shape_cast %49 : vector<16xf32> to vector<16x1xf32>
    %cst_29 = arith.constant dense<0.000000e+00> : vector<1x16xf32>
    %51 = tpu.matmul %45, %44, %cst_29 {dimension_numbers = #tpu.dot_dimension_numbers<[1], [1], [0], [0], [0, 0, 1, 0], [], []>} : vector<1x128xf32>, vector<16x128xf32>, vector<1x16xf32> -> vector<1x16xf32>
    %52 = vector.broadcast %50 : vector<16x1xf32> to vector<16x16xf32>
    %53 = vector.broadcast %51 : vector<1x16xf32> to vector<16x16xf32>
    %54 = arith.addf %52, %53 : vector<16x16xf32>
    %cst_30 = arith.constant 0.000000e+00 : f32
    %55 = vector.broadcast %cst_30 : f32 to vector<16x16xf32>
    %56 = arith.cmpf ogt, %54, %55 : vector<16x16xf32>
    %cst_31 = arith.constant 2.000000e-01 : f32
    %57 = vector.broadcast %cst_31 : f32 to vector<16x16xf32>
    %58 = arith.mulf %57, %54 : vector<16x16xf32>
    %59 = arith.select %56, %54, %58 : vector<16x16xi1>, vector<16x16xf32>
    %cst_32 = arith.constant 0.000000e+00 : f32
    %60 = vector.broadcast %cst_32 : f32 to vector<16x16xf32>
    %61 = arith.cmpf ogt, %0, %60 : vector<16x16xf32>
    %cst_33 = arith.constant -1.000000e+30 : f32
    %62 = vector.broadcast %cst_33 : f32 to vector<16x16xf32>
    %63 = arith.select %61, %59, %62 : vector<16x16xi1>, vector<16x16xf32>
    %cst_34 = arith.constant dense<0xFF800000> : vector<16xf32>
    %64 = vector.multi_reduction <maximumf>, %63, %cst_34 [1] : vector<16x16xf32> to vector<16xf32>
    %65 = vector.shape_cast %64 : vector<16xf32> to vector<16x1xf32>
    %66 = vector.broadcast %65 : vector<16x1xf32> to vector<16x16xf32>
    %67 = arith.subf %63, %66 : vector<16x16xf32>
    %68 = math.exp %67 : vector<16x16xf32>
    %cst_35 = arith.constant dense<0.000000e+00> : vector<16xf32>
    %69 = vector.multi_reduction <add>, %68, %cst_35 [1] : vector<16x16xf32> to vector<16xf32>
    %70 = vector.shape_cast %69 : vector<16xf32> to vector<16x1xf32>
    %71 = tpu.reciprocal %70 {approx = true} : vector<16x1xf32> -> vector<16x1xf32>
    %72 = vector.broadcast %71 : vector<16x1xf32> to vector<16x16xf32>
    %73 = arith.mulf %68, %72 : vector<16x16xf32>
    %74 = arith.truncf %73 : vector<16x16xf32> to vector<16x16xbf16>
    %75 = arith.truncf %44 : vector<16x128xf32> to vector<16x128xbf16>
    %cst_36 = arith.constant dense<0.000000e+00> : vector<16x128xf32>
    %76 = tpu.matmul %74, %75, %cst_36 {dimension_numbers = #tpu.dot_dimension_numbers<[1], [0], [0], [1], [0, 0, 1, 1], [], []>} : vector<16x16xbf16>, vector<16x128xbf16>, vector<16x128xf32> -> vector<16x128xf32>
    %c0_37 = arith.constant 0 : index
    %c0_38 = arith.constant 0 : index
    %77 = vector.load %arg9[%c0_37, %c0_38] : memref<1x128xf32, #tpu.memory_space<vmem>>, vector<1x128xf32>
    %78 = vector.broadcast %77 : vector<1x128xf32> to vector<16x128xf32>
    %79 = arith.addf %76, %78 : vector<16x128xf32>
    %c0_39 = arith.constant 0 : index
    %c0_40 = arith.constant 0 : index
    %80 = vector.load %arg10[%c0_39, %c0_40] : memref<16x128xf32, #tpu.memory_space<vmem>>, vector<16x128xf32>
    tpu.vector_store %arg10[%c0_39, %c0_40], %79 {strides = array<i32>} : memref<16x128xf32, #tpu.memory_space<vmem>>, vector<16x128xf32>,
    return
  }
}

</mosaic_0001>

<bundles_post_ra>
// kernel: gat2_forward.1
= control target key start
LH: loop header
LB: loop body
LE: loop exit
PB: predicated region body
PF: predicated region fallthrough
CT: control target
= control target key end

     0   :  { %15 = vsyncpa [#allocation3], 0  ;;  %s1043_s0 = inlined_call_operand.vmem [shape: f32[16,128], index: 0, kind: input, shape index: {}]   ;;  %s1044_s1 = inlined_call_operand.vmem [shape: f32[16,16], index: 1, kind: input, shape index: {}]   ;;  %s1045_s2 = inlined_call_operand.hbm [shape: bf16[128,128], index: 2, kind: input, shape index: {}]   ;;  %s1046_s3 = inlined_call_operand.vmem [shape: f32[1,128], index: 3, kind: input, shape index: {}]   ;;  %s1047_s4 = inlined_call_operand.vmem [shape: f32[1,128], index: 4, kind: input, shape index: {}]   ;;  %s1048_s5 = inlined_call_operand.vmem [shape: f32[1,128], index: 5, kind: input, shape index: {}]   ;;  %s1049_s6 = inlined_call_operand.hbm [shape: bf16[128,128], index: 6, kind: input, shape index: {}]   ;;  %s1050_s7 = inlined_call_operand.vmem [shape: f32[1,128], index: 7, kind: input, shape index: {}]   ;;  %s1051_s8 = inlined_call_operand.vmem [shape: f32[1,128], index: 8, kind: input, shape index: {}]   ;;  %s1052_s9 = inlined_call_operand.vmem [shape: f32[1,128], index: 9, kind: input, shape index: {}]   ;;  %s1053_s10 = inlined_call_operand.hbm [shape: f32[16,128], index: 10, kind: output, shape index: {}]  }
   0x1   :  { %16 = vsyncpa [#allocation6], 0 }
   0x2   :  { %17 = vsyncpa [#allocation4], 0  ;;  %s875_s13 = smov [#allocation2]  }
   0x3   :  { %s27_s14 = sshll.u32 %s875_s13, 4  ;;  %s28_s14 = int_to_ptr.vmem [resolvable:$true] %s27_s14 }
   0x4   :  { %s817_s15 = scalar_lea.vmem %s28_s14, 1024  ;;  %p822_p1 = scmp.lt.s32.totalorder %s28_s14, %s28_s14 }
   0x5   :  { %p818_p0 = scmp.ne.s32.totalorder %s28_s14, %s817_s15  ;;  %p823_p2 = scmp.lt.s32.totalorder %s817_s15, %s817_s15 }
   0x7   :  { %p824_p3 = por %p823_p2, %p822_p1 }
   0x9   :  { %p825_p4 = pnand %p824_p3, %p818_p0 }
   0xb   :  { %828 = shalt.err (!%p825_p4)
}
   0xc   :  { %s876_s16 = smov 64   ;;  %s877_s17 = smov 4  }
   0xd   :  { %33 = dma.hbm_to_vmem [thread:$0]  %s1045_s2, 1024, %s28_s14, [#allocation3], %s876_s16, %s876_s16, %s877_s17  }
   0xe   :  { %s878_s20 = smov [#allocation5]  }
   0xf   :  { %s45_s21 = sshll.u32 %s878_s20, 4  ;;  %s46_s21 = int_to_ptr.vmem [resolvable:$true] %s45_s21 }
  0x10   :  { %s837_s22 = scalar_lea.vmem %s46_s21, 1024  ;;  %p842_p6 = scmp.lt.s32.totalorder %s46_s21, %s46_s21 }
  0x11   :  { %p838_p5 = scmp.ne.s32.totalorder %s46_s21, %s837_s22  ;;  %p843_p7 = scmp.lt.s32.totalorder %s837_s22, %s837_s22 }
  0x13   :  { %p844_p8 = por %p843_p7, %p842_p6 }
  0x15   :  { %p845_p9 = pnand %p844_p8, %p838_p5 }
  0x17   :  { %848 = shalt.err (!%p845_p9)
}
  0x18   :  { %51 = dma.hbm_to_vmem [thread:$0]  %s1049_s6, 1024, %s46_s21, [#allocation6], %s876_s16, %s876_s16, %s877_s17  }
  0x19   :  { %869 = dma.done.wait [#allocation3], 1024  }
  0x1a   :  { %870 = vsyncadd [#allocation3], 4294966272 }
  0x1b   :  { %871 = dma.done.wait [#allocation6], 1024  }
  0x1c   :  { %872 = vsyncadd [#allocation6], 4294966272  ;;  %v879_v0 = vmov 0.0   ;;  %vm880_vm0 = vmmov 0   ;;  %v777_v1 = vld [vmem:[#allocation2 + $0x38] sm:$0xff]   ;;  %v778_v2 = vld [vmem:[#allocation2 + $0x30] sm:$0xff]   ;;  %v259_v21 = vlaneseq }
  0x1d   :  { %702 = vmatprep.subr.bf16.mxu0 %v879_v0  ;;  %718 = vmatprep.mubr.msk.bf16.mxu0 %vm880_vm0, %v879_v0  ;;  %v779_v3 = vld [vmem:[#allocation2 + $0x28] sm:$0xff]   ;;  %v780_v4 = vld [vmem:[#allocation2 + $0x20] sm:$0xff]   ;;  %v781_v5 = vld [vmem:[#allocation2 + $0x18] sm:$0xff]   ;;  %vm275_vm4 = vcmask 130048   ;;  %s881_s16 = smov [#allocation7]  }
  0x1e   :  { %722 = vmatprep.subr.mxu1 %v879_v0  ;;  %726 = vmatprep.mubr.msk.f32.mxu1 %vm880_vm0, %v879_v0  ;;  %v782_v6 = vld [vmem:[#allocation2 + $0x10] sm:$0xff]   ;;  %v783_v7 = vld [vmem:[#allocation2 + $0x8] sm:$0xff]   ;;  %v784_v8 = vld [vmem:[#allocation2] sm:$0xff]   ;;  %v978_v22 = vshrl.u32 %v259_v21, 7  ;;  %s639_s17 = sshll.u32 %s881_s16, 4  ;;  %s640_s17 = int_to_ptr.vmem [resolvable:$true] %s639_s17 }
  0x1f   :  { %703 = vmatpush3.bf16.msra.mxu0 %v777_v1  ;;  %v67_v9 = vld [vmem:[%s1043_s0] sm:$0xff]  ;;  %v68_v10 = vld [vmem:[%s1043_s0 + $0x8] sm:$0xff]  ;;  %v785_v57 = vld [vmem:[#allocation5 + $0x38] sm:$0xff]   ;;  %s849_s18 = scalar_lea.vmem %s640_s17, 256  ;;  %p854_p11 = scmp.lt.s32.totalorder %s640_s17, %s640_s17 }
  0x20   :  { %704 = vmatprep.subr.bf16.mxu0 %v879_v0  ;;  %v69_v11 = vpack.c.bf16 %v68_v10, %v67_v9  ;;  %v660_v12 = vld [vmem:[%s1047_s4] ss:$0 sm:$0xff]  ;;  %v261_v24 = vsub.s32 0, %v978_v22  ;;  %v992_v32 = vld [vmem:[%s1044_s1 + $0x8] sm:$0xff]  ;;  %v786_v59 = vld [vmem:[#allocation5 + $0x30] sm:$0xff]   ;;  %p850_p10 = scmp.ne.s32.totalorder %s640_s17, %s849_s18  ;;  %p855_p12 = scmp.lt.s32.totalorder %s849_s18, %s849_s18 }
  0x21   :  { %v175_v19 = vld [vmem:[%s1046_s3] sm:$0x1]  ;;  %vm272_vm5 = vcmp.gt.f32.partialorder %v992_v32, 0.0  ;;  %v787_v60 = vld [vmem:[#allocation5 + $0x28] sm:$0xff]   ;;  %v789_v62 = vld [vmem:[#allocation5 + $0x18] sm:$0xff]  }
  0x22   :  { %v986_v27 = vld [vmem:[%s1044_s1] sm:$0xff]  ;;  %v790_v63 = vld [vmem:[#allocation5 + $0x10] sm:$0xff]   ;;  %v791_v1 = vld [vmem:[#allocation5 + $0x8] sm:$0xff]   ;;  %p856_p13 = por %p855_p12, %p854_p11 }
  0x23   :  { %705 = vmatpush3.bf16.msra.mxu0 %v778_v2  ;;  %vm271_vm1 = vcmp.gt.f32.partialorder %v986_v27, 0.0  ;;  %v788_v61 = vld [vmem:[#allocation5 + $0x20] sm:$0xff]  }
  0x24   :  { %706 = vmatprep.subr.bf16.mxu0 %v879_v0  ;;  %v792_v2 = vld [vmem:[#allocation5] sm:$0xff]   ;;  %p857_p0 = pnand %p856_p13, %p850_p10 }
  0x27   :  { %707 = vmatpush3.bf16.msra.mxu0 %v779_v3  ;;  %v661_v3 = vld [vmem:[%s1048_s5] ss:$0 sm:$0xff] }
  0x28   :  { %708 = vmatprep.subr.bf16.mxu0 %v879_v0 }
  0x2b   :  { %709 = vmatpush3.bf16.msra.mxu0 %v780_v4 }
  0x2c   :  { %710 = vmatprep.subr.bf16.mxu0 %v879_v0 }
  0x2f   :  { %711 = vmatpush3.bf16.msra.mxu0 %v781_v5 }
  0x30   :  { %712 = vmatprep.subr.bf16.mxu0 %v879_v0 }
  0x33   :  { %713 = vmatpush3.bf16.msra.mxu0 %v782_v6 }
  0x34   :  { %714 = vmatprep.subr.bf16.mxu0 %v879_v0 }
  0x37   :  { %715 = vmatpush3.bf16.msra.mxu0 %v783_v7 }
  0x38   :  { %716 = vmatprep.subr.bf16.mxu0 %v879_v0 }
  0x3b   :  { %717 = vmatpush3.bf16.msra.mxu0 %v784_v8 }
  0x3c   :  { %755 = vmatprep.subr.mxu0 %v879_v0 }
  0x3e   :  { %719 = vmatmul.mubr.bf16.vlgmr.msra.gmra.mxu0 %v69_v11 }
  0x3f   :  { %759 = vmatprep.mubr.msk.f32.mxu0 %vm880_vm0, %v879_v0 }
  0xfe   :  { %v168_v13 = vpop.f32.mrf.mxu0 }
  0xff   :  { %v183_v14 = vmul.f32 %v660_v12, %v168_v13 }
 0x100   :  { %v720_v15 = vpop.f32.mrf.mxu0 }
 0x101   :  { %185 = vadd.xlane.f32.xlu0 %v183_v14 }
 0x102   :  { %v171_v16 = vpop.f32.mrf.mxu0 }
 0x103   :  { %723 = vmatpush3.xpose.msra.mxu1 %v171_v16  ;;  %v184_v17 = vmul.f32 %v660_v12, %v171_v16  ;;  %v299_v20 = vpack.c.bf16 %v171_v16, %v168_v13 }
 0x104   :  { %v721_v18 = vpop.f32.mrf.mxu0  ;;  %724 = vmatprep.subr.mxu1 %v879_v0 }
 0x105   :  { %187 = vadd.xlane.f32.xlu0 %v184_v17 }
 0x107   :  { %725 = vmatpush3.xpose.msra.mxu1 %v168_v13  ;;  %v671_v13 = vld [vmem:[%s1051_s8] ss:$0 sm:$0xff] }
 0x108   :  { %729 = vmatprep.subr.bf16.mxu1 %v879_v0 }
 0x10a   :  { %727 = vmatmul.mubr.f32.vlgmr.msra.gmra.mxu1 %v175_v19 }
 0x10b   :  { %730 = vmatpush3.bf16.msra.mxu1 %v299_v20  ;;  %731 = vmatprep.mubr.msk.bf16.mxu1 %vm880_vm0, %v879_v0  ;;  %v459_v20 = vld [vmem:[%s1050_s7] sm:$0x1] }
 0x10c   :  { %735 = vmatprep.subr.bf16.mxu1 %v879_v0 }
 0x18a   :  { %v186_v23 = vpop.xlane.xlu0 %185 }
 0x18e   :  { %v188_v28 = vpop.xlane.xlu0 %187 }
 0x1ca   :  { %v255_v25 = vpop.f32.mrf.mxu1 }
 0x1cb   :  { %v262_v26 = vrot.slane %v255_v25, %v261_v24 }
 0x1cc   :  { %v728_v29 = vpop.f32.mrf.mxu1 }
 0x1cd   :  { %v263_v30 = vadd.f32 %v262_v26, %v186_v23  ;;  %v264_v31 = vadd.f32 %v262_v26, %v188_v28 }
 0x1cf   :  { %vm265_vm2 = vcmp.gt.f32.partialorder %v263_v30, 0.0  ;;  %v267_v33 = vmul.f32 0.2, %v263_v30  ;;  %vm266_vm3 = vcmp.gt.f32.partialorder %v264_v31, 0.0  ;;  %v268_v34 = vmul.f32 0.2, %v264_v31 }
 0x1d1   :  { %v269_v35 = vsel %vm265_vm2, %v263_v30, %v267_v33  ;;  %v270_v36 = vsel %vm266_vm3, %v264_v31, %v268_v34 }
 0x1d2   :  { %v273_v37 = vsel %vm271_vm1, %v269_v35, -1e+30  ;;  %v274_v39 = vsel %vm272_vm5, %v270_v36, -1e+30 }
 0x1d3   :  { %v276_v38 = vsel %vm275_vm4, %v273_v37, -inf  ;;  %v279_v40 = vsel %vm275_vm4, %v274_v39, -inf }
 0x1d4   :  { %277 = vmax.xlane.f32.xlu1 %v276_v38 }
 0x1d8   :  { %280 = vmax.xlane.f32.xlu1 %v279_v40 }
 0x25d   :  { %v278_v41 = vpop.xlane.xlu1 %277 }
 0x25e   :  { %v282_v42 = vsub.f32 %v273_v37, %v278_v41 }
 0x260   :  { %v284_v43 = vmul.f32 1.442695, %v282_v42 }
 0x261   :  { %v281_v44 = vpop.xlane.xlu1 %280 }
 0x262   :  { %793 = vpow2.f32 %v284_v43  ;;  %v283_v45 = vsub.f32 %v274_v39, %v281_v44 }
 0x264   :  { %v286_v46 = vmul.f32 1.442695, %v283_v45 }
 0x266   :  { %795 = vpow2.f32 %v286_v46 }
 0x26f   :  { %v794_v47 = vpop.eup %793 }
 0x270   :  { %v288_v48 = vsel %vm275_vm4, %v794_v47, 0.0 }
 0x271   :  { %289 = vadd.xlane.f32.xlu0 %v288_v48 }
 0x273   :  { %v796_v49 = vpop.eup %795 }
 0x274   :  { %v291_v50 = vsel %vm275_vm4, %v796_v49, 0.0 }
 0x275   :  { %292 = vadd.xlane.f32.xlu1 %v291_v50 }
 0x2fa   :  { %v290_v51 = vpop.xlane.xlu0 %289 }
 0x2fb   :  { %797 = vrcp.f32 %v290_v51 }
 0x2fe   :  { %v293_v52 = vpop.xlane.xlu1 %292 }
 0x2ff   :  { %799 = vrcp.f32 %v293_v52 }
 0x308   :  { %v798_v53 = vpop.eup %797 }
 0x309   :  { %v296_v55 = vmul.f32 %v798_v53, %v794_v47  ;;  %v672_v53 = vld [vmem:[%s1052_s9] ss:$0 sm:$0xff] }
 0x30c   :  { %v800_v54 = vpop.eup %799 }
 0x30d   :  { %v297_v56 = vmul.f32 %v800_v54, %v796_v49 }
 0x30f   :  { %v298_v58 = vpack.c.bf16 %v297_v56, %v296_v55 }
 0x311   :  { %732 = vmatmul.mubr.msk.bf16.vlgmr.msra.gmra.mxu1 %vm275_vm4, %v298_v58 }
 0x312   :  { %736 = vmatpush3.bf16.msra.mxu1 %v785_v57  ;;  %751 = vmatprep.mubr.msk.bf16.mxu1 %vm880_vm0, %v879_v0 }
 0x313   :  { %737 = vmatprep.subr.bf16.mxu1 %v879_v0 }
 0x316   :  { %738 = vmatpush3.bf16.msra.mxu1 %v786_v59 }
 0x317   :  { %739 = vmatprep.subr.bf16.mxu1 %v879_v0 }
 0x31a   :  { %740 = vmatpush3.bf16.msra.mxu1 %v787_v60 }
 0x31b   :  { %741 = vmatprep.subr.bf16.mxu1 %v879_v0 }
 0x31e   :  { %742 = vmatpush3.bf16.msra.mxu1 %v788_v61 }
 0x31f   :  { %743 = vmatprep.subr.bf16.mxu1 %v879_v0 }
 0x322   :  { %744 = vmatpush3.bf16.msra.mxu1 %v789_v62 }
 0x323   :  { %745 = vmatprep.subr.bf16.mxu1 %v879_v0 }
 0x326   :  { %746 = vmatpush3.bf16.msra.mxu1 %v790_v63 }
 0x327   :  { %747 = vmatprep.subr.bf16.mxu1 %v879_v0 }
 0x32a   :  { %748 = vmatpush3.bf16.msra.mxu1 %v791_v1 }
 0x32b   :  { %749 = vmatprep.subr.bf16.mxu1 %v879_v0 }
 0x32e   :  { %750 = vmatpush3.bf16.msra.mxu1 %v792_v2 }
 0x3d1   :  { %v344_v4 = vpop.f32.mrf.mxu1 }
 0x3d2   :  { %v345_v6 = vadd.f32 %v661_v3, %v344_v4 }
 0x3d3   :  { %v733_v5 = vpop.f32.mrf.mxu1 }
 0x3d4   :  { %v351_v10 = vmax.f32 %v345_v6, 0.0 }
 0x3d5   :  { %v347_v7 = vpop.f32.mrf.mxu1 }
 0x3d6   :  { %v348_v8 = vadd.f32 %v661_v3, %v347_v7 }
 0x3d7   :  { %v734_v9 = vpop.f32.mrf.mxu1 }
 0x3d8   :  { %v352_v11 = vmax.f32 %v348_v8, 0.0 }
 0x3da   :  { %v353_v12 = vpack.c.bf16 %v352_v11, %v351_v10 }
 0x3dc   :  { %752 = vmatmul.mubr.bf16.vlgmr.msra.gmra.mxu1 %v353_v12 }
 0x49c   :  { %v452_v14 = vpop.f32.mrf.mxu1 }
 0x49d   :  { %v467_v15 = vmul.f32 %v671_v13, %v452_v14 }
 0x49e   :  { %v753_v16 = vpop.f32.mrf.mxu1 }
 0x49f   :  { %469 = vadd.xlane.f32.xlu0 %v467_v15 }
 0x4a0   :  { %v455_v17 = vpop.f32.mrf.mxu1 }
 0x4a1   :  { %756 = vmatpush3.xpose.msra.mxu0 %v455_v17  ;;  %v468_v18 = vmul.f32 %v671_v13, %v455_v17  ;;  %v580_v21 = vpack.c.bf16 %v455_v17, %v452_v14 }
 0x4a2   :  { %v754_v19 = vpop.f32.mrf.mxu1  ;;  %757 = vmatprep.subr.mxu0 %v879_v0 }
 0x4a3   :  { %471 = vadd.xlane.f32.xlu1 %v468_v18 }
 0x4a5   :  { %758 = vmatpush3.xpose.msra.mxu0 %v452_v14 }
 0x4a6   :  { %762 = vmatprep.subr.bf16.mxu0 %v879_v0 }
 0x4a8   :  { %760 = vmatmul.mubr.f32.vlgmr.msra.gmra.mxu0 %v459_v20 }
 0x4a9   :  { %763 = vmatpush3.bf16.msra.mxu0 %v580_v21  ;;  %764 = vmatprep.mubr.msk.bf16.mxu0 %vm880_vm0, %v879_v0 }
 0x528   :  { %v470_v25 = vpop.xlane.xlu0 %469 }
 0x52c   :  { %v472_v28 = vpop.xlane.xlu1 %471 }
 0x568   :  { %v539_v23 = vpop.f32.mrf.mxu0 }
 0x569   :  { %v546_v26 = vrot.slane %v539_v23, %v261_v24 }
 0x56a   :  { %v761_v29 = vpop.f32.mrf.mxu0 }
 0x56b   :  { %v547_v30 = vadd.f32 %v546_v26, %v470_v25  ;;  %v548_v31 = vadd.f32 %v546_v26, %v472_v28 }
 0x56d   :  { %vm549_vm6 = vcmp.gt.f32.partialorder %v547_v30, 0.0  ;;  %v551_v33 = vmul.f32 0.2, %v547_v30  ;;  %vm550_vm7 = vcmp.gt.f32.partialorder %v548_v31, 0.0  ;;  %v552_v34 = vmul.f32 0.2, %v548_v31 }
 0x56f   :  { %v553_v35 = vsel %vm549_vm6, %v547_v30, %v551_v33  ;;  %v554_v36 = vsel %vm550_vm7, %v548_v31, %v552_v34 }
 0x570   :  { %v555_v37 = vsel %vm271_vm1, %v553_v35, -1e+30  ;;  %v556_v0 = vsel %vm272_vm5, %v554_v36, -1e+30 }
 0x571   :  { %v557_v38 = vsel %vm275_vm4, %v555_v37, -inf  ;;  %v560_v22 = vsel %vm275_vm4, %v556_v0, -inf }
 0x572   :  { %558 = vmax.xlane.f32.xlu0 %v557_v38  ;;  %561 = vmax.xlane.f32.xlu1 %v560_v22 }
 0x5fb   :  { %v559_v24 = vpop.xlane.xlu0 %558  ;;  %v562_v39 = vpop.xlane.xlu1 %561 }
 0x5fc   :  { %v563_v40 = vsub.f32 %v555_v37, %v559_v24  ;;  %v564_v41 = vsub.f32 %v556_v0, %v562_v39 }
 0x5fe   :  { %v565_v42 = vmul.f32 1.442695, %v563_v40  ;;  %v567_v43 = vmul.f32 1.442695, %v564_v41 }
 0x600   :  { %801 = vpow2.f32 %v565_v42 }
 0x601   :  { %803 = vpow2.f32 %v567_v43 }
 0x60d   :  { %v802_v44 = vpop.eup %801 }
 0x60e   :  { %v804_v27 = vpop.eup %803  ;;  %v569_v45 = vsel %vm275_vm4, %v802_v44, 0.0 }
 0x60f   :  { %570 = vadd.xlane.f32.xlu0 %v569_v45  ;;  %v572_v32 = vsel %vm275_vm4, %v804_v27, 0.0 }
 0x610   :  { %573 = vadd.xlane.f32.xlu1 %v572_v32 }
 0x698   :  { %v571_v46 = vpop.xlane.xlu0 %570 }
 0x699   :  { %805 = vrcp.f32 %v571_v46  ;;  %v574_v47 = vpop.xlane.xlu1 %573 }
 0x69a   :  { %807 = vrcp.f32 %v574_v47 }
 0x6a6   :  { %v806_v48 = vpop.eup %805 }
 0x6a7   :  { %v808_v49 = vpop.eup %807  ;;  %v577_v50 = vmul.f32 %v806_v48, %v802_v44 }
 0x6a8   :  { %v578_v51 = vmul.f32 %v808_v49, %v804_v27 }
 0x6aa   :  { %v579_v52 = vpack.c.bf16 %v578_v51, %v577_v50 }
 0x6ac   :  { %765 = vmatmul.mubr.msk.bf16.vlgmr.msra.gmra.mxu0 %vm275_vm4, %v579_v52 }
 0x76c   :  { %v625_v54 = vpop.f32.mrf.mxu0 }
 0x76d   :  { %v626_v55 = vadd.f32 %v672_v53, %v625_v54 }
 0x76e   :  { %v766_v56 = vpop.f32.mrf.mxu0 }
 0x76f   :  { %632 = vst [vmem:[#allocation7] sm:$0xff] %v626_v55 }
 0x770   :  { %v628_v57 = vpop.f32.mrf.mxu0 }
 0x771   :  { %v629_v58 = vadd.f32 %v672_v53, %v628_v57 }
 0x772   :  { %v767_v59 = vpop.f32.mrf.mxu0 }
 0x773   :  { %633 = vst [vmem:[#allocation7 + $0x8] sm:$0xff] %v629_v58 }
 0x774   :  { %860 = shalt.err (!%p857_p0)
}
 0x775   :  { %s882_s19 = smov 128   ;;  %s883_s9 = smov 8  }
 0x776   :  { %645 = dma.vmem_to_hbm [thread:$0]  %s640_s17, 256, %s1053_s10, [#allocation4], %s882_s19, %s882_s19, %s883_s9  }
 0x777   :  { %873 = dma.done.wait [#allocation4], 256  }
 0x778   :  { %874 = vsyncadd [#allocation4], 4294967040 }
 0x779   :  { %649 = vsyncpa [#allocation3], 1 }
 0x77a   :  { %650 = vsyncpa [#allocation6], 1 }
 0x77b   :  { %651 = vsyncpa [#allocation4], 1 }

</bundles_post_ra>
